<compile_context>
chip_gen: v5e
topology: v5e:2x2
jax: 0.10.0
libtpu: 0.0.40
codegen_flags: <defaults>
</compile_context>

<pallas_src>
import functools
import math

import jax
import jax.numpy as jnp
from jax.experimental import pallas as pl
from jax.experimental.pallas import tpu as pltpu

EPS = 1e-6                      # nn.LayerNorm(eps=1e-06)
SOFTMAX_APPROX_RECIP = True     # EUP vrcp; not bit-exact vs torch.softmax (set False for parity tests)


def _detect_vmem_budget():
    """Generation-gate scoped-VMEM limit and row-tile depth (v5e/v6e: 128 MiB, v7x: 64 MiB)."""
    cap = None
    try:
        cap = int(pltpu.get_tpu_info().vmem_capacity_bytes)
    except Exception:
        try:
            kind = jax.devices()[0].device_kind.lower()
            if ("v5" in kind) or ("v6" in kind):
                cap = 128 * 1024 * 1024
        except Exception:
            cap = None
    if cap is not None and cap >= 100 * 1024 * 1024:
        return 96 * 1024 * 1024, 512      # v5e / v6e: use the big VMEM, deeper row tiles
    return 48 * 1024 * 1024, 256          # v7x-sized (64 MiB physical) or unknown: conservative


VMEM_LIMIT, MAX_ROW_TILE = _detect_vmem_budget()


def _compiler_params(n_parallel_axes=1):
    return pltpu.CompilerParams(
        dimension_semantics=("parallel",) * n_parallel_axes,
        vmem_limit_bytes=VMEM_LIMIT)


def _row_tile(n):
    # Full array if it fits, otherwise a multiple-of-8/16 row tile (partial last tile is masked).
    return n if n <= MAX_ROW_TILE else MAX_ROW_TILE


def _q_block(s):
    # Query-row block for the attention grid's second ('parallel') axis.
    if s > 256 and s % 256 == 0:
        return 256
    if s > 128 and s % 128 == 0:
        return 128
    return s


@functools.lru_cache(maxsize=None)
def _single_buffered_weights_ok():
    """Probe once whether BlockSpec(pipeline_mode=pl.Buffered(1)) is supported by this runtime."""
    def _copy(x_ref, o_ref):
        o_ref[...] = x_ref[...]
    try:
        spec = pl.BlockSpec((8, 128), lambda i: (0, 0), pipeline_mode=pl.Buffered(1))
        out = pl.pallas_call(
            _copy,
            out_shape=jax.ShapeDtypeStruct((8, 128), jnp.float32),
            grid=(1,),
            in_specs=[spec],
            out_specs=pl.BlockSpec((8, 128), lambda i: (0, 0)),
            compiler_params=_compiler_params(),
        )(jnp.zeros((8, 128), jnp.float32))
        jax.block_until_ready(out)
        return True
    except Exception:
        return False


def _const_spec(shape):
    """BlockSpec for a grid-invariant (VMEM-resident) weight/bias: constant index_map,
    single-buffered when supported so the redundant second VMEM copy is not allocated."""
    index_map = lambda *_: (0,) * len(shape)
    if _single_buffered_weights_ok():
        return pl.BlockSpec(shape, index_map, pipeline_mode=pl.Buffered(1))
    return pl.BlockSpec(shape, index_map)


# ----------------------------- Pallas kernels -----------------------------

def _layernorm_kernel(x_ref, g_ref, b_ref, o_ref):
    x = x_ref[...].astype(jnp.float32)
    mean = jnp.mean(x, axis=-1, keepdims=True)
    var = jnp.mean(jnp.square(x - mean), axis=-1, keepdims=True)
    y = (x - mean) * jax.lax.rsqrt(var + EPS)
    o_ref[...] = (y * g_ref[...] + b_ref[...]).astype(o_ref.dtype)


def layernorm_rows(x2d, gamma, beta, out_dtype=None):
    n, d = x2d.shape
    out_dtype = x2d.dtype if out_dtype is None else out_dtype
    tile = _row_tile(n)
    return pl.pallas_call(
        _layernorm_kernel,
        out_shape=jax.ShapeDtypeStruct((n, d), out_dtype),
        grid=(pl.cdiv(n, tile),),
        in_specs=[pl.BlockSpec((tile, d), lambda i: (i, 0)),
                  _const_spec((1, d)),
                  _const_spec((1, d))],
        out_specs=pl.BlockSpec((tile, d), lambda i: (i, 0)),
        compiler_params=_compiler_params(),
    )(x2d, gamma.reshape(1, d), beta.reshape(1, d))


def _linear_kernel(x_ref, w_ref, b_ref, o_ref):
    # bf16 MXU operands, f32 accumulation.
    y = jnp.dot(x_ref[...].astype(w_ref.dtype), w_ref[...],
                preferred_element_type=jnp.float32) + b_ref[...]
    o_ref[...] = y.astype(o_ref.dtype)


def linear_rows(x2d, w, b, out_dtype=None):
    n, d_in = x2d.shape
    d_out = w.shape[1]
    out_dtype = x2d.dtype if out_dtype is None else out_dtype
    tile = _row_tile(n)
    return pl.pallas_call(
        _linear_kernel,
        out_shape=jax.ShapeDtypeStruct((n, d_out), out_dtype),
        grid=(pl.cdiv(n, tile),),
        in_specs=[pl.BlockSpec((tile, d_in), lambda i: (i, 0)),
                  _const_spec((d_in, d_out)),      # weight stays VMEM-resident (single buffer)
                  _const_spec((1, d_out))],
        out_specs=pl.BlockSpec((tile, d_out), lambda i: (i, 0)),
        compiler_params=_compiler_params(),
    )(x2d, w, b.reshape(1, d_out))


def _ln_qkv_kernel(x_ref, g_ref, b_ref, w_ref, bias_ref, o_ref):
    # LayerNorm fused with the stacked (d, 3d) QKV projection: xn never touches HBM.
    x = x_ref[...].astype(jnp.float32)
    mean = jnp.mean(x, axis=-1, keepdims=True)
    var = jnp.mean(jnp.square(x - mean), axis=-1, keepdims=True)
    xn = (x - mean) * jax.lax.rsqrt(var + EPS) * g_ref[...] + b_ref[...]
    y = jnp.dot(xn.astype(w_ref.dtype), w_ref[...],
                preferred_element_type=jnp.float32) + bias_ref[...]
    o_ref[...] = y.astype(o_ref.dtype)


def ln_qkv(x2d, gamma, beta, wqkv, bqkv):
    n, d = x2d.shape
    d3 = wqkv.shape[1]
    tile = _row_tile(n)
    return pl.pallas_call(
        _ln_qkv_kernel,
        out_shape=jax.ShapeDtypeStruct((n, d3), jnp.bfloat16),      # qkv carried in bf16
        grid=(pl.cdiv(n, tile),),
        in_specs=[pl.BlockSpec((tile, d), lambda i: (i, 0)),
                  _const_spec((1, d)),
                  _const_spec((1, d)),
                  _const_spec((d, d3)),
                  _const_spec((1, d3))],
        out_specs=pl.BlockSpec((tile, d3), lambda i: (i, 0)),
        compiler_params=_compiler_params(),
    )(x2d, gamma.reshape(1, d), beta.reshape(1, d), wqkv, bqkv.reshape(1, d3))


def _attn_kernel(q_ref, k_ref, v_ref, res_ref, woh_ref, bo_ref, o_ref):
    # One (batch, query-block) per grid step; ALL heads via a single batched contraction.
    # The 1/sqrt(dh) query scale is folded into wqkv at parameter-prep time.
    # Output projection + residual add fused in the epilogue (ctx never written to HBM).
    qh = q_ref[0]                                          # (H, TQ, dh) bf16
    kh = k_ref[0]                                          # (H, S,  dh) bf16
    vh = v_ref[0]                                          # (H, S,  dh) bf16

    # TODO(synk): for long sequences (S >= ~1k, lower threshold on v7x's 64 MiB VMEM) switch to a
    # K/V-blocked online-softmax (flash-style) loop instead of materializing (H, TQ, S) scores.
    scores = jnp.einsum('hqd,hkd->hqk', qh, kh,
                        preferred_element_type=jnp.float32)          # (H, TQ, S) f32
    m = jnp.max(scores, axis=-1, keepdims=True)
    p = jnp.exp(scores - m)
    denom = jnp.sum(p, axis=-1, keepdims=True)
    if SOFTMAX_APPROX_RECIP:
        p = p * pl.reciprocal(denom, approx=True)
    else:
        p = p / denom
    ctx = jnp.einsum('hqk,hkd->hqd', p.astype(vh.dtype), vh,
                     preferred_element_type=jnp.float32)             # (H, TQ, dh) f32

    # Output projection as a per-head batched matmul + sum over heads (no in-kernel relayout),
    # then residual add in the epilogue.
    y = jnp.einsum('hqc,hcd->hqd', ctx.astype(woh_ref.dtype), woh_ref[...],
                   preferred_element_type=jnp.float32)               # (H, TQ, D) f32
    y = jnp.sum(y, axis=0) + bo_ref[...] + res_ref[0].astype(jnp.float32)
    o_ref[0] = y.astype(o_ref.dtype)


def attn_outproj_residual(qkv2d, residual2d, wo_heads, bo, b, s, heads, dh):
    """Fused self-attention + output projection + residual.
    qkv2d: (B*S, 3D) bf16; residual2d: (B*S, D) bf16; returns (B*S, D) bf16."""
    d = heads * dh
    # Head split done in the wrapper (cheap XLA relayout) so the kernel sees lane-clean
    # (H, S, dh) operands and never reshapes across the (8,128) tile.
    qkv = qkv2d.reshape(b, s, 3, heads, dh)
    q = jnp.transpose(qkv[:, :, 0], (0, 2, 1, 3))          # (B, H, S, dh)
    k = jnp.transpose(qkv[:, :, 1], (0, 2, 1, 3))
    v = jnp.transpose(qkv[:, :, 2], (0, 2, 1, 3))
    res = residual2d.reshape(b, s, d)

    tq = _q_block(s)
    out = pl.pallas_call(
        _attn_kernel,
        out_shape=jax.ShapeDtypeStruct((b, s, d), residual2d.dtype),
        grid=(b, s // tq),                                  # 2-D parallel grid (v7x megacore)
        in_specs=[pl.BlockSpec((1, heads, tq, dh), lambda i, j: (i, 0, j, 0)),
                  pl.BlockSpec((1, heads, s, dh), lambda i, j: (i, 0, 0, 0)),
                  pl.BlockSpec((1, heads, s, dh), lambda i, j: (i, 0, 0, 0)),
                  pl.BlockSpec((1, tq, d), lambda i, j: (i, j, 0)),
                  _const_spec((heads, dh, d)),
                  _const_spec((1, d))],
        out_specs=pl.BlockSpec((1, tq, d), lambda i, j: (i, j, 0)),
        compiler_params=_compiler_params(2),
    )(q, k, v, res, wo_heads, bo.reshape(1, d))
    return out.reshape(b * s, d)


def _ffn_kernel(x_ref, g_ref, b_ref, w1_ref, b1_ref, w2_ref, b2_ref, o_ref):
    # LayerNorm -> W1 + ReLU -> W2 -> + residual, per row tile.
    # The (tile, d_ff) hidden activation stays in VMEM/vregs only, and is bf16 after the ReLU.
    x = x_ref[...].astype(jnp.float32)
    mean = jnp.mean(x, axis=-1, keepdims=True)
    var = jnp.mean(jnp.square(x - mean), axis=-1, keepdims=True)
    xn = (x - mean) * jax.lax.rsqrt(var + EPS) * g_ref[...] + b_ref[...]
    h = jnp.dot(xn.astype(w1_ref.dtype), w1_ref[...],
                preferred_element_type=jnp.float32) + b1_ref[...]
    h = jnp.maximum(h, 0.0).astype(w2_ref.dtype)            # bf16 hidden -> half the spill traffic
    y = jnp.dot(h, w2_ref[...], preferred_element_type=jnp.float32) + b2_ref[...]
    o_ref[...] = (y + x).astype(o_ref.dtype)


def ffn_residual(x2d, gamma, beta, w1, b1, w2, b2):
    n, d = x2d.shape
    f = w1.shape[1]
    tile = _row_tile(n)
    return pl.pallas_call(
        _ffn_kernel,
        out_shape=jax.ShapeDtypeStruct((n, d), x2d.dtype),
        grid=(pl.cdiv(n, tile),),
        in_specs=[pl.BlockSpec((tile, d), lambda i: (i, 0)),
                  _const_spec((1, d)),
                  _const_spec((1, d)),
                  _const_spec((d, f)),
                  _const_spec((1, f)),
                  _const_spec((f, d)),
                  _const_spec((1, d))],
        out_specs=pl.BlockSpec((tile, d), lambda i: (i, 0)),
        compiler_params=_compiler_params(),
    )(x2d, gamma.reshape(1, d), beta.reshape(1, d),
      w1, b1.reshape(1, f), w2, b2.reshape(1, d))


# ----------------------------- model (glue) -----------------------------

def encoder_layer_fwd(x2d, b, s, p, heads):
    """Pre-norm transformer encoder layer (dropout == identity at inference).
    x2d: (B*S, D) bf16 residual stream, B-major row ordering."""
    d = x2d.shape[1]
    dh = d // heads
    qkv = ln_qkv(x2d, p["ln_att_g"], p["ln_att_b"], p["wqkv"], p["bqkv"])       # (B*S, 3D) bf16
    x2d = attn_outproj_residual(qkv, x2d, p["wo_heads"], p["bo"], b, s, heads, dh)
    x2d = ffn_residual(x2d, p["ln_ffn_g"], p["ln_ffn_b"],
                       p["w1"], p["b1"], p["w2"], p["b2"])                      # ffn + residual
    return x2d


def transformer_encoder_fwd(src, params, lengths=None):
    """src: (S, B, 409) -> (emb, modal_all, lengths)
    emb: (S, B, D) f32; modal_all: (S, B, 3*D) f32.
    """
    s_len, bsz, feat = src.shape
    d = params["d_model"]
    heads = params["heads"]

    # TODO(synk): ModalFusion source is not provided; implemented as a deterministic per-modality
    # linear projection to d_model via one block-diagonal stacked weight (409 features zero-padded
    # to 512 so the contraction dim is a 128-multiple). Runs once per forward; ~2/3 of the
    # contraction multiplies structural zeros — acceptable unless it shows up in a profile.
    feat_pad = params["fus_w"].shape[0]
    src_pad = jnp.pad(src, ((0, 0), (0, 0), (0, feat_pad - feat)))
    fused = linear_rows(src_pad.reshape(s_len * bsz, feat_pad),
                        params["fus_w"], params["fus_b"],
                        out_dtype=jnp.float32)                                  # (S*B, 3D) f32
    fused = fused.reshape(s_len, bsz, 3 * d)
    fus_l = fused[:, :, :d]          # seq-first, matches (seq, batch, d)
    fus_v = fused[:, :, d:2 * d]
    fus_a = fused[:, :, 2 * d:]

    def run_stack(src_mod, stack):
        x = jnp.transpose(src_mod, (1, 0, 2))               # (B, S, D), like .transpose(0,1)
        b_, s_, d_ = x.shape
        x2 = x.reshape(b_ * s_, d_).astype(jnp.bfloat16)    # residual stream carried in bf16
        for p in stack:
            x2 = encoder_layer_fwd(x2, b_, s_, p, heads)
        x2 = layernorm_rows(x2, params["ln_g"], params["ln_b"], out_dtype=jnp.float32)
        return x2.reshape(b_, s_, d_)

    out_text = run_stack(fus_l, params["text_layers"])
    out_visual = run_stack(fus_v, params["visual_layers"])
    out_audio = run_stack(fus_a, params["audio_layers"])

    modal_all = jnp.concatenate([out_text, out_visual, out_audio], axis=2)      # (B, S, 3D)
    emb = fus_l                                                                 # src_text
    # NOTE: the reference forward passes mask=None, so no padding mask is applied and `lengths`
    # is only shape-checked / passed through — same here.
    # NOTE: self.linear_align exists in __init__ but is unused in forward.
    return emb, jnp.transpose(modal_all, (1, 0, 2)), lengths


# ----------------------------- parameter init -----------------------------

def init_params(key, num_layers, d_model, heads, d_ff):
    keys = iter(jax.random.split(key, 4096))
    dh = d_model // heads
    q_scale = 1.0 / math.sqrt(dh)

    def w(shape, scale=0.02):
        return (scale * jax.random.normal(next(keys), shape)).astype(jnp.float32)

    def layer_params():
        wq, wk, wv = w((d_model, d_model)), w((d_model, d_model)), w((d_model, d_model))
        wo = w((d_model, d_model))
        return {
            "ln_att_g": jnp.ones((d_model,), jnp.float32),
            "ln_att_b": jnp.zeros((d_model,), jnp.float32),
            # onmt query scaling (1/sqrt(dh)) folded into the query third of the stacked weight
            # (exact here because the q bias is zero).
            "wqkv": jnp.concatenate([wq * q_scale, wk, wv], axis=1).astype(jnp.bfloat16),
            "bqkv": jnp.zeros((3 * d_model,), jnp.float32),
            # Output projection pre-split per head: wo_heads[h] == wo[h*dh:(h+1)*dh, :].
            "wo_heads": wo.reshape(heads, dh, d_model).astype(jnp.bfloat16),
            "bo": jnp.zeros((d_model,), jnp.float32),
            "ln_ffn_g": jnp.ones((d_model,), jnp.float32),
            "ln_ffn_b": jnp.zeros((d_model,), jnp.float32),
            "w1": w((d_model, d_ff)).astype(jnp.bfloat16),
            "b1": jnp.zeros((d_ff,), jnp.float32),
            "w2": w((d_ff, d_model)).astype(jnp.bfloat16),
            "b2": jnp.zeros((d_model,), jnp.float32),
        }

    # Block-diagonal fusion projection over the 409->512 zero-padded features (bf16 weight).
    feat_pad = 512
    fus_w = jnp.zeros((feat_pad, 3 * d_model), jnp.float32)
    fus_w = fus_w.at[0:300, 0:d_model].set(w((300, d_model)))
    fus_w = fus_w.at[300:335, d_model:2 * d_model].set(w((35, d_model)))
    fus_w = fus_w.at[335:409, 2 * d_model:].set(w((74, d_model)))
    fus_b = jnp.zeros((3 * d_model,), jnp.float32)

    return {
        "d_model": d_model,
        "heads": heads,
        "fus_w": fus_w.astype(jnp.bfloat16), "fus_b": fus_b,
        "text_layers": [layer_params() for _ in range(num_layers)],
        "visual_layers": [layer_params() for _ in range(num_layers)],
        "audio_layers": [layer_params() for _ in range(num_layers)],
        "ln_g": jnp.ones((d_model,), jnp.float32),
        "ln_b": jnp.zeros((d_model,), jnp.float32),
    }


# ----------------------------- main -----------------------------

if __name__ == "__main__":
    # Small shapes consistent with the module's forward: src is (seq, batch, 409)
    # (the 300/35/74 feature split is hard-coded); d_model scaled down from 512 but
    # kept at a 128-multiple so feature dims stay lane-dense.
    SEQ, BATCH = 8, 2
    D_MODEL, HEADS, D_FF, NUM_LAYERS = 128, 4, 256, 2

    key = jax.random.PRNGKey(0)
    k_src, k_par = jax.random.split(key)
    src = jax.random.normal(k_src, (SEQ, BATCH, 409), dtype=jnp.float32)
    lengths = jnp.full((BATCH,), SEQ, dtype=jnp.int32)

    params = init_params(k_par, NUM_LAYERS, D_MODEL, HEADS, D_FF)

    emb, modal_all, lens_out = transformer_encoder_fwd(src, params, lengths)
    jax.block_until_ready((emb, modal_all))

    assert emb.shape == (SEQ, BATCH, D_MODEL)
    assert modal_all.shape == (SEQ, BATCH, 3 * D_MODEL)
    assert lens_out.shape == (BATCH,)
    assert bool(jnp.all(jnp.isfinite(emb))) and bool(jnp.all(jnp.isfinite(modal_all)))
    print("KERNEL_OK")
</pallas_src>

<mosaic_0001>
module attributes {stable_mosaic.version = 11 : i64} {
  func.func @_copy(%arg0: i32, %arg1: memref<8x128xf32, #tpu.memory_space<vmem>>, %arg2: memref<8x128xf32, #tpu.memory_space<vmem>>) attributes {dimension_semantics = [#tpu.dimension_semantics<parallel>], iteration_bounds = array<i64: 1>, scalar_prefetch = 0 : i64, scratch_operands = 0 : i64, tpu.core_type = #tpu.core_type<tc>, window_params = [{pipeline_mode = #tpu.pipeline_mode<synchronous>, transform_indices = @transform_0, window_bounds = array<i64: 8, 128>}, {pipeline_mode = #tpu.pipeline_mode<synchronous>, transform_indices = @transform_1, window_bounds = array<i64: 8, 128>}]} {
    %c0 = arith.constant 0 : index
    %c0_0 = arith.constant 0 : index
    %0 = vector.load %arg1[%c0, %c0_0] : memref<8x128xf32, #tpu.memory_space<vmem>>, vector<8x128xf32>
    %c0_1 = arith.constant 0 : index
    %c0_2 = arith.constant 0 : index
    %1 = vector.load %arg2[%c0_1, %c0_2] : memref<8x128xf32, #tpu.memory_space<vmem>>, vector<8x128xf32>
    tpu.vector_store %arg2[%c0_1, %c0_2], %0 {strides = array<i32>} : memref<8x128xf32, #tpu.memory_space<vmem>>, vector<8x128xf32>,
    return
  }
  func.func @transform_0(%arg0: i32) -> (i32, i32) {
    %c0_i32 = arith.constant 0 : i32
    %c0_i32_0 = arith.constant 0 : i32
    %c0_i32_1 = arith.constant 0 : i32
    return %c0_i32, %c0_i32_0 : i32, i32
  }
  func.func @transform_1(%arg0: i32) -> (i32, i32) {
    %c0_i32 = arith.constant 0 : i32
    %c0_i32_0 = arith.constant 0 : i32
    %c0_i32_1 = arith.constant 0 : i32
    return %c0_i32, %c0_i32_0 : i32, i32
  }
}

module attributes {stable_mosaic.version = 11 : i64} {
  func.func @_linear_kernel(%arg0: i32, %arg1: memref<16x512xf32, #tpu.memory_space<vmem>>, %arg2: memref<512x384xbf16, #tpu.memory_space<vmem>>, %arg3: memref<1x384xf32, #tpu.memory_space<vmem>>, %arg4: memref<16x384xf32, #tpu.memory_space<vmem>>) attributes {dimension_semantics = [#tpu.dimension_semantics<parallel>], iteration_bounds = array<i64: 1>, scalar_prefetch = 0 : i64, scratch_operands = 0 : i64, tpu.core_type = #tpu.core_type<tc>, window_params = [{transform_indices = @transform_0, window_bounds = array<i64: 16, 512>}, {pipeline_mode = #tpu.pipeline_mode<synchronous>, transform_indices = @transform_1, window_bounds = array<i64: 512, 384>}, {pipeline_mode = #tpu.pipeline_mode<synchronous>, transform_indices = @transform_2, window_bounds = array<i64: 1, 384>}, {transform_indices = @transform_3, window_bounds = array<i64: 16, 384>}]} {
    %c0 = arith.constant 0 : index
    %c0_0 = arith.constant 0 : index
    %0 = vector.load %arg1[%c0, %c0_0] : memref<16x512xf32, #tpu.memory_space<vmem>>, vector<16x512xf32>
    %1 = arith.truncf %0 : vector<16x512xf32> to vector<16x512xbf16>
    %c0_1 = arith.constant 0 : index
    %c0_2 = arith.constant 0 : index
    %2 = vector.load %arg2[%c0_1, %c0_2] : memref<512x384xbf16, #tpu.memory_space<vmem>>, vector<512x384xbf16>
    %cst = arith.constant dense<0.000000e+00> : vector<16x384xf32>
    %3 = tpu.matmul %1, %2, %cst {dimension_numbers = #tpu.dot_dimension_numbers<[1], [0], [0], [1], [0, 0, 1, 1], [], []>} : vector<16x512xbf16>, vector<512x384xbf16>, vector<16x384xf32> -> vector<16x384xf32>
    %c0_3 = arith.constant 0 : index
    %c0_4 = arith.constant 0 : index
    %4 = vector.load %arg3[%c0_3, %c0_4] : memref<1x384xf32, #tpu.memory_space<vmem>>, vector<1x384xf32>
    %5 = vector.broadcast %4 : vector<1x384xf32> to vector<16x384xf32>
    %6 = arith.addf %3, %5 : vector<16x384xf32>
    %c0_5 = arith.constant 0 : index
    %c0_6 = arith.constant 0 : index
    %7 = vector.load %arg4[%c0_5, %c0_6] : memref<16x384xf32, #tpu.memory_space<vmem>>, vector<16x384xf32>
    tpu.vector_store %arg4[%c0_5, %c0_6], %6 {strides = array<i32>} : memref<16x384xf32, #tpu.memory_space<vmem>>, vector<16x384xf32>,
    return
  }
  func.func @transform_0(%arg0: i32) -> (i32, i32) {
    %c0_i32 = arith.constant 0 : i32
    %c0_i32_0 = arith.constant 0 : i32
    return %arg0, %c0_i32 : i32, i32
  }
  func.func @transform_1(%arg0: i32) -> (i32, i32) {
    %c0_i32 = arith.constant 0 : i32
    %c0_i32_0 = arith.constant 0 : i32
    %c0_i32_1 = arith.constant 0 : i32
    return %c0_i32, %c0_i32_0 : i32, i32
  }
  func.func @transform_2(%arg0: i32) -> (i32, i32) {
    %c0_i32 = arith.constant 0 : i32
    %c0_i32_0 = arith.constant 0 : i32
    %c0_i32_1 = arith.constant 0 : i32
    return %c0_i32, %c0_i32_0 : i32, i32
  }
  func.func @transform_3(%arg0: i32) -> (i32, i32) {
    %c0_i32 = arith.constant 0 : i32
    %c0_i32_0 = arith.constant 0 : i32
    return %arg0, %c0_i32 : i32, i32
  }
}

</mosaic_0001>

<bundles_post_ra>
// kernel: tpu_custom_call.1
= control target key start
LH: loop header
LB: loop body
LE: loop exit
PB: predicated region body
PF: predicated region fallthrough
CT: control target
= control target key end

     0   :  { %6 = vsyncpa [#allocation3], 0  ;;  %s114_s0 = inlined_call_operand.hbm [shape: f32[8,128], index: 0, kind: input, shape index: {}]   ;;  %s115_s1 = inlined_call_operand.hbm [shape: f32[8,128], index: 1, kind: output, shape index: {}]  }
   0x1   :  { %7 = vsyncpa [#allocation4], 0  ;;  %s13_s8 = sshll.u32 %s114_s0, 4  ;;  %s96_s9 = smov [#allocation2]   ;;  %s14_s8 = int_to_ptr.hbm [resolvable:$true] %s13_s8 }
   0x2   :  { %s15_s10 = sshll.u32 %s96_s9, 4  ;;  %s16_s10 = int_to_ptr.vmem [resolvable:$true] %s15_s10 }
   0x3   :  { %18 = dma.hbm_to_vmem [thread:$0]  %s14_s8, 128, %s16_s10, [#allocation3]  }
   0x4   :  { %92 = dma.done.wait [#allocation3], 128  }
   0x5   :  { %93 = vsyncadd [#allocation3], 4294967168  ;;  %s97_s11 = smov [#allocation5]   ;;  %s32_s15 = sshll.u32 %s115_s1, 4  ;;  %v23_v0 = vld [vmem:[#allocation2] sm:$0xff]  ;;  %s33_s15 = int_to_ptr.hbm [resolvable:$true] %s32_s15 }
   0x6   :  { %s30_s12 = sshll.u32 %s97_s11, 4  ;;  %24 = vst [vmem:[#allocation5] sm:$0xff] %v23_v0  ;;  %s31_s12 = int_to_ptr.vmem [resolvable:$true] %s30_s12 }
   0x7   :  { %35 = dma.vmem_to_hbm [thread:$0]  %s31_s12, 128, %s33_s15, [#allocation4]  }
   0x8   :  { %94 = dma.done.wait [#allocation4], 128  }
   0x9   :  { %95 = vsyncadd [#allocation4], 4294967168 }
   0xa   :  { %40 = vsyncpa [#allocation3], 1 }
   0xb   :  { %41 = vsyncpa [#allocation4], 1 }

// kernel: tpu_custom_call.1
= control target key start
LH: loop header
LB: loop body
LE: loop exit
PB: predicated region body
PF: predicated region fallthrough
CT: control target
= control target key end

     0   :  { %8 = vsyncpa [#allocation3], 0  ;;  %s1568_s0 = inlined_call_operand.hbm [shape: f32[16,512], index: 0, kind: input, shape index: {}]   ;;  %s1569_s1 = inlined_call_operand.hbm [shape: bf16[512,384], index: 1, kind: input, shape index: {}]   ;;  %s1570_s2 = inlined_call_operand.hbm [shape: f32[1,384], index: 2, kind: input, shape index: {}]   ;;  %s1571_s3 = inlined_call_operand.hbm [shape: f32[16,384], index: 3, kind: output, shape index: {}]  }
   0x1   :  { %9 = vsyncpa [#allocation6], 0  ;;  %s28_s14 = sshll.u32 %s1569_s1, 4  ;;  %s29_s14 = int_to_ptr.hbm [resolvable:$true] %s28_s14 }
   0x2   :  { %10 = vsyncpa [#allocation4], 0  ;;  %s1506_s15 = smov [#allocation5]   ;;  %s15_s19 = sshll.u32 %s1568_s0, 4  ;;  %s16_s19 = int_to_ptr.hbm [resolvable:$true] %s15_s19 }
   0x3   :  { %s30_s16 = sshll.u32 %s1506_s15, 4  ;;  %s1507_s20 = smov 192   ;;  %s31_s16 = int_to_ptr.vmem [resolvable:$true] %s30_s16 }
   0x4   :  { %s1508_s21 = smov 12   ;;  %s1509_s22 = smov [#allocation2]  }
   0x5   :  { %36 = dma.hbm_to_vmem [thread:$0]  %s29_s14, 12288, %s31_s16, [#allocation6], %s1507_s20, %s1507_s20, %s1508_s21  }
   0x6   :  { %s17_s23 = sshll.u32 %s1509_s22, 4  ;;  %s1510_s24 = smov 512   ;;  %s18_s23 = int_to_ptr.vmem [resolvable:$true] %s17_s23 }
   0x7   :  { %s1511_s25 = smov 32   ;;  %s42_s27 = sshll.u32 %s1570_s2, 4  ;;  %s43_s27 = int_to_ptr.hbm [resolvable:$true] %s42_s27 }
   0x8   :  { %23 = dma.hbm_to_vmem [thread:$0]  %s16_s19, 1024, %s18_s23, [#allocation3], %s1510_s24, %s1510_s24, %s1511_s25  }
   0x9   :  { %s1512_s28 = smov [#allocation7]  }
   0xa   :  { %s44_s29 = sshll.u32 %s1512_s28, 4  ;;  %s45_s29 = int_to_ptr.vmem [resolvable:$true] %s44_s29 }
   0xb   :  { %47 = dma.hbm_to_vmem [thread:$0]  %s43_s27, 48, %s45_s29, [#allocation6]  }
   0xc   :  { %1500 = dma.done.wait [#allocation3], 1024  }
   0xd   :  { %1501 = vsyncadd [#allocation3], 4294966272 }
   0xe   :  { %1502 = dma.done.wait [#allocation6], 12336  }
   0xf   :  { %1503 = vsyncadd [#allocation6], 4294954960  ;;  %v1000_v0 = vld [vmem:[#allocation5 + $0xa8] sm:$0xf]  ;;  %v1320_v1 = vld [vmem:[#allocation5 + $0xb0] sm:$0xf0] }
  0x10   :  { %v1096_v2 = vld [vmem:[#allocation5 + $0x168] sm:$0xf]  ;;  %v1001_v3 = vor.u32 %v1320_v1, %v1000_v0  ;;  %v1344_v4 = vld [vmem:[#allocation5 + $0x170] sm:$0xf0]  ;;  %v988_v11 = vld [vmem:[#allocation5 + $0x90] sm:$0xf] }
  0x11   :  { %v1192_v5 = vld [vmem:[#allocation5 + $0x228] sm:$0xf]  ;;  %v1368_v6 = vld [vmem:[#allocation5 + $0x230] sm:$0xf0]  ;;  %v1097_v7 = vor.u32 %v1344_v4, %v1096_v2  ;;  %v1317_v13 = vld [vmem:[#allocation5 + $0x98] sm:$0xf0] }
  0x12   :  { %v1193_v8 = vor.u32 %v1368_v6, %v1192_v5  ;;  %v1288_v9 = vld [vmem:[#allocation5 + $0x2e8] sm:$0xf]  ;;  %v1392_v10 = vld [vmem:[#allocation5 + $0x2f0] sm:$0xf0]  ;;  %720 = vmatpush.bf16.msra.mxu0 %v1001_v3  ;;  %v1084_v14 = vld [vmem:[#allocation5 + $0x150] sm:$0xf]  ;;  %v989_v16 = vor.u32 %v1317_v13, %v988_v11 }
  0x13   :  { %v1289_v12 = vor.u32 %v1392_v10, %v1288_v9  ;;  %v1341_v15 = vld [vmem:[#allocation5 + $0x158] sm:$0xf0]  ;;  %734 = vmatpush.bf16.msra.mxu1 %v1097_v7  ;;  %v1180_v18 = vld [vmem:[#allocation5 + $0x210] sm:$0xf]  ;;  %v976_v23 = vld [vmem:[#allocation5 + $0x78] sm:$0xf] }
  0x14   :  { %748 = vmatpush.bf16.msra.mxu2 %v1193_v8  ;;  %v1085_v17 = vor.u32 %v1341_v15, %v1084_v14  ;;  %v1365_v19 = vld [vmem:[#allocation5 + $0x218] sm:$0xf0]  ;;  %v1276_v20 = vld [vmem:[#allocation5 + $0x2d0] sm:$0xf]  ;;  %v1314_v24 = vld [vmem:[#allocation5 + $0x80] sm:$0xf0] }
  0x15   :  { %762 = vmatpush.bf16.msra.mxu3 %v1289_v12  ;;  %v1181_v21 = vor.u32 %v1365_v19, %v1180_v18  ;;  %v1389_v22 = vld [vmem:[#allocation5 + $0x2d8] sm:$0xf0]  ;;  %v1072_v26 = vld [vmem:[#allocation5 + $0x138] sm:$0xf]  ;;  %v1338_v27 = vld [vmem:[#allocation5 + $0x140] sm:$0xf0]  ;;  %v977_v29 = vor.u32 %v1314_v24, %v976_v23 }
  0x16   :  { %v1277_v25 = vor.u32 %v1389_v22, %v1276_v20  ;;  %v1168_v28 = vld [vmem:[#allocation5 + $0x1f8] sm:$0xf]  ;;  %721 = vmatpush.bf16.msra.mxu0 %v989_v16  ;;  %v1362_v30 = vld [vmem:[#allocation5 + $0x200] sm:$0xf0]  ;;  %v1073_v33 = vor.u32 %v1338_v27, %v1072_v26  ;;  %v964_v35 = vld [vmem:[#allocation5 + $0x60] sm:$0xf] }
  0x17   :  { %v1264_v31 = vld [vmem:[#allocation5 + $0x2b8] sm:$0xf]  ;;  %v1386_v32 = vld [vmem:[#allocation5 + $0x2c0] sm:$0xf0]  ;;  %735 = vmatpush.bf16.msra.mxu1 %v1085_v17  ;;  %v1169_v34 = vor.u32 %v1362_v30, %v1168_v28  ;;  %v1311_v36 = vld [vmem:[#allocation5 + $0x68] sm:$0xf0] }
  0x18   :  { %749 = vmatpush.bf16.msra.mxu2 %v1181_v21  ;;  %v1060_v37 = vld [vmem:[#allocation5 + $0x120] sm:$0xf]  ;;  %v1265_v38 = vor.u32 %v1386_v32, %v1264_v31  ;;  %v1335_v39 = vld [vmem:[#allocation5 + $0x128] sm:$0xf0]  ;;  %v965_v44 = vor.u32 %v1311_v36, %v964_v35  ;;  %v952_v47 = vld [vmem:[#allocation5 + $0x48] sm:$0xf] }
  0x19   :  { %763 = vmatpush.bf16.msra.mxu3 %v1277_v25  ;;  %v1156_v40 = vld [vmem:[#allocation5 + $0x1e0] sm:$0xf]  ;;  %v1359_v41 = vld [vmem:[#allocation5 + $0x1e8] sm:$0xf0]  ;;  %v1061_v45 = vor.u32 %v1335_v39, %v1060_v37  ;;  %v1308_v48 = vld [vmem:[#allocation5 + $0x50] sm:$0xf0] }
  0x1a   :  { %v1252_v42 = vld [vmem:[#allocation5 + $0x2a0] sm:$0xf]  ;;  %v1383_v43 = vld [vmem:[#allocation5 + $0x2a8] sm:$0xf0]  ;;  %722 = vmatpush.bf16.msra.mxu0 %v977_v29  ;;  %v1157_v46 = vor.u32 %v1359_v41, %v1156_v40  ;;  %v1048_v49 = vld [vmem:[#allocation5 + $0x108] sm:$0xf]  ;;  %v953_v56 = vor.u32 %v1308_v48, %v952_v47 }
  0x1b   :  { %736 = vmatpush.bf16.msra.mxu1 %v1073_v33  ;;  %v1253_v50 = vor.u32 %v1383_v43, %v1252_v42  ;;  %v1332_v51 = vld [vmem:[#allocation5 + $0x110] sm:$0xf0]  ;;  %v1144_v52 = vld [vmem:[#allocation5 + $0x1c8] sm:$0xf]  ;;  %v940_v59 = vld [vmem:[#allocation5 + $0x30] sm:$0xf] }
  0x1c   :  { %750 = vmatpush.bf16.msra.mxu2 %v1169_v34  ;;  %v1356_v53 = vld [vmem:[#allocation5 + $0x1d0] sm:$0xf0]  ;;  %v1240_v54 = vld [vmem:[#allocation5 + $0x288] sm:$0xf]  ;;  %v1049_v57 = vor.u32 %v1332_v51, %v1048_v49  ;;  %v1305_v60 = vld [vmem:[#allocation5 + $0x38] sm:$0xf0] }
  0x1d   :  { %764 = vmatpush.bf16.msra.mxu3 %v1265_v38  ;;  %v1380_v55 = vld [vmem:[#allocation5 + $0x290] sm:$0xf0]  ;;  %v1145_v58 = vor.u32 %v1356_v53, %v1144_v52  ;;  %v1036_v61 = vld [vmem:[#allocation5 + $0xf0] sm:$0xf]  ;;  %v1329_v63 = vld [vmem:[#allocation5 + $0xf8] sm:$0xf0]  ;;  %v941_v4 = vor.u32 %v1305_v60, %v940_v59 }
  0x1e   :  { %723 = vmatpush.bf16.msra.mxu0 %v965_v44  ;;  %v1241_v62 = vor.u32 %v1380_v55, %v1240_v54  ;;  %v1132_v0 = vld [vmem:[#allocation5 + $0x1b0] sm:$0xf]  ;;  %v1353_v1 = vld [vmem:[#allocation5 + $0x1b8] sm:$0xf0]  ;;  %v1037_v5 = vor.u32 %v1329_v63, %v1036_v61  ;;  %v928_v7 = vld [vmem:[#allocation5 + $0x18] sm:$0xf] }
  0x1f   :  { %737 = vmatpush.bf16.msra.mxu1 %v1061_v45  ;;  %v1228_v2 = vld [vmem:[#allocation5 + $0x270] sm:$0xf]  ;;  %v1377_v3 = vld [vmem:[#allocation5 + $0x278] sm:$0xf0]  ;;  %v1133_v6 = vor.u32 %v1353_v1, %v1132_v0  ;;  %v1302_v8 = vld [vmem:[#allocation5 + $0x20] sm:$0xf0] }
  0x20   :  { %751 = vmatpush.bf16.msra.mxu2 %v1157_v46  ;;  %v1024_v9 = vld [vmem:[#allocation5 + $0xd8] sm:$0xf]  ;;  %v1229_v10 = vor.u32 %v1377_v3, %v1228_v2  ;;  %v1326_v11 = vld [vmem:[#allocation5 + $0xe0] sm:$0xf0]  ;;  %v929_v16 = vor.u32 %v1302_v8, %v928_v7  ;;  %v916_v17 = vld [vmem:[#allocation5] sm:$0xf] }
  0x21   :  { %765 = vmatpush.bf16.msra.mxu3 %v1253_v50  ;;  %v1120_v12 = vld [vmem:[#allocation5 + $0x198] sm:$0xf]  ;;  %v1350_v13 = vld [vmem:[#allocation5 + $0x1a0] sm:$0xf0]  ;;  %v1299_v18 = vld [vmem:[#allocation5 + $0x8] sm:$0xf0]  ;;  %v1025_v19 = vor.u32 %v1326_v11, %v1024_v9 }
  0x22   :  { %724 = vmatpush.bf16.msra.mxu0 %v953_v56  ;;  %v1216_v14 = vld [vmem:[#allocation5 + $0x258] sm:$0xf]  ;;  %v1374_v15 = vld [vmem:[#allocation5 + $0x260] sm:$0xf0]  ;;  %v1121_v20 = vor.u32 %v1350_v13, %v1120_v12  ;;  %v1012_v21 = vld [vmem:[#allocation5 + $0xc0] sm:$0xf]  ;;  %v917_v31 = vor.u32 %v1299_v18, %v916_v17 }
  0x23   :  { %738 = vmatpush.bf16.msra.mxu1 %v1049_v57  ;;  %v1323_v22 = vld [vmem:[#allocation5 + $0xc8] sm:$0xf0]  ;;  %v1108_v23 = vld [vmem:[#allocation5 + $0x180] sm:$0xf]  ;;  %v1217_v24 = vor.u32 %v1374_v15, %v1216_v14  ;;  %v1002_v29 = vld [vmem:[#allocation5 + $0xb4] sm:$0xf0] }
  0x24   :  { %752 = vmatpush.bf16.msra.mxu2 %v1145_v58  ;;  %v1347_v25 = vld [vmem:[#allocation5 + $0x188] sm:$0xf0]  ;;  %v1204_v26 = vld [vmem:[#allocation5 + $0x240] sm:$0xf]  ;;  %v1098_v32 = vld [vmem:[#allocation5 + $0x174] sm:$0xf0]  ;;  %v1013_v35 = vor.u32 %v1323_v22, %v1012_v21 }
  0x25   :  { %766 = vmatpush.bf16.msra.mxu3 %v1241_v62  ;;  %v1371_v27 = vld [vmem:[#allocation5 + $0x248] sm:$0xf0]  ;;  %v1194_v34 = vld [vmem:[#allocation5 + $0x234] sm:$0xf0]  ;;  %v1109_v36 = vor.u32 %v1347_v25, %v1108_v23  ;;  %v1316_v43 = vld [vmem:[#allocation5 + $0x94] sm:$0xf] }
  0x26   :  { %725 = vmatpush.bf16.msra.mxu0 %v941_v4  ;;  %v1319_v28 = vld [vmem:[#allocation5 + $0xac] sm:$0xf]  ;;  %v1290_v38 = vld [vmem:[#allocation5 + $0x2f4] sm:$0xf0]  ;;  %v1205_v39 = vor.u32 %v1371_v27, %v1204_v26  ;;  %v990_v44 = vld [vmem:[#allocation5 + $0x9c] sm:$0xf0] }
  0x27   :  { %739 = vmatpush.bf16.msra.mxu1 %v1037_v5  ;;  %v1343_v30 = vld [vmem:[#allocation5 + $0x16c] sm:$0xf]  ;;  %v1005_v40 = vor.u32 %v1319_v28, %v1002_v29  ;;  %v1340_v45 = vld [vmem:[#allocation5 + $0x154] sm:$0xf]  ;;  %v1086_v47 = vld [vmem:[#allocation5 + $0x15c] sm:$0xf0]  ;;  %v993_v52 = vor.u32 %v1316_v43, %v990_v44 }
  0x28   :  { %753 = vmatpush.bf16.msra.mxu2 %v1133_v6  ;;  %v1367_v33 = vld [vmem:[#allocation5 + $0x22c] sm:$0xf]  ;;  %v1101_v41 = vor.u32 %v1343_v30, %v1098_v32  ;;  %v1364_v48 = vld [vmem:[#allocation5 + $0x214] sm:$0xf]  ;;  %v1182_v49 = vld [vmem:[#allocation5 + $0x21c] sm:$0xf0]  ;;  %v1089_v56 = vor.u32 %v1340_v45, %v1086_v47 }
  0x29   :  { %767 = vmatpush.bf16.msra.mxu3 %v1229_v10  ;;  %v1391_v37 = vld [vmem:[#allocation5 + $0x2ec] sm:$0xf]  ;;  %v1197_v42 = vor.u32 %v1367_v33, %v1194_v34  ;;  %v1388_v50 = vld [vmem:[#allocation5 + $0x2d4] sm:$0xf]  ;;  %v1278_v51 = vld [vmem:[#allocation5 + $0x2dc] sm:$0xf0]  ;;  %v1185_v57 = vor.u32 %v1364_v48, %v1182_v49 }
  0x2a   :  { %726 = vmatpush.bf16.msra.mxu0 %v929_v16  ;;  %v1293_v46 = vor.u32 %v1391_v37, %v1290_v38  ;;  %v1313_v53 = vld [vmem:[#allocation5 + $0x7c] sm:$0xf]  ;;  %v978_v54 = vld [vmem:[#allocation5 + $0x84] sm:$0xf0]  ;;  %v62_v60 = vld [vmem:[#allocation2 + $0x10] sm:$0xff]  ;;  %v1281_v61 = vor.u32 %v1388_v50, %v1278_v51  ;;  %s1513_s0 = smov [#allocation8]  }
  0x2b   :  { %740 = vmatpush.bf16.msra.mxu1 %v1025_v19  ;;  %v1337_v55 = vld [vmem:[#allocation5 + $0x13c] sm:$0xf]  ;;  %v1074_v58 = vld [vmem:[#allocation5 + $0x144] sm:$0xf0]  ;;  %v66_v0 = vld [vmem:[#allocation2 + $0x30] sm:$0xff]  ;;  %v981_v5 = vor.u32 %v1313_v53, %v978_v54  ;;  %s898_s2 = sshll.u32 %s1513_s0, 4  ;;  %s899_s2 = int_to_ptr.vmem [resolvable:$true] %s898_s2 }
  0x2c   :  { %754 = vmatpush.bf16.msra.mxu2 %v1121_v20  ;;  %v1361_v59 = vld [vmem:[#allocation5 + $0x1fc] sm:$0xf]  ;;  %v1170_v62 = vld [vmem:[#allocation5 + $0x204] sm:$0xf0]  ;;  %v1310_v2 = vld [vmem:[#allocation5 + $0x64] sm:$0xf]  ;;  %v1545_v4 = vpack.c.bf16 %v66_v0, %v62_v60  ;;  %v1077_v10 = vor.u32 %v1337_v55, %v1074_v58 }
  0x2d   :  { %768 = vmatpush.bf16.msra.mxu3 %v1217_v24  ;;  %v1385_v63 = vld [vmem:[#allocation5 + $0x2bc] sm:$0xf]  ;;  %v1266_v1 = vld [vmem:[#allocation5 + $0x2c4] sm:$0xf0]  ;;  %v966_v3 = vld [vmem:[#allocation5 + $0x6c] sm:$0xf0]  ;;  %v1173_v11 = vor.u32 %v1361_v59, %v1170_v62 }
  0x2e   :  { %727 = vmatpush.bf16.msra.mxu0 %v917_v31  ;;  %v1334_v6 = vld [vmem:[#allocation5 + $0x124] sm:$0xf]  ;;  %v1062_v7 = vld [vmem:[#allocation5 + $0x12c] sm:$0xf0]  ;;  %v63_v14 = vld [vmem:[#allocation2 + $0x18] sm:$0xff]  ;;  %v1269_v15 = vor.u32 %v1385_v63, %v1266_v1  ;;  %v969_v24 = vor.u32 %v1310_v2, %v966_v3  ;;  %s900_s5 = sshll.u32 %s1571_s3, 4  ;;  %s901_s5 = int_to_ptr.hbm [resolvable:$true] %s900_s5 }
  0x2f   :  { %741 = vmatpush.bf16.msra.mxu1 %v1013_v35  ;;  %v1358_v8 = vld [vmem:[#allocation5 + $0x1e4] sm:$0xf]  ;;  %v1158_v9 = vld [vmem:[#allocation5 + $0x1ec] sm:$0xf0]  ;;  %v67_v17 = vld [vmem:[#allocation2 + $0x38] sm:$0xff]  ;;  %v1065_v25 = vor.u32 %v1334_v6, %v1062_v7  ;;  %s1514_s6 = smov 384  }
  0x30   :  { %755 = vmatpush.bf16.msra.mxu2 %v1109_v36  ;;  %v60_v12 = vld [vmem:[#allocation2] sm:$0xff]  ;;  %v61_v18 = vld [vmem:[#allocation2 + $0x8] sm:$0xff]  ;;  %v1254_v21 = vld [vmem:[#allocation5 + $0x2ac] sm:$0xf0]  ;;  %v1550_v22 = vpack.c.bf16 %v67_v17, %v63_v14  ;;  %v1161_v26 = vor.u32 %v1358_v8, %v1158_v9  ;;  %s1515_s7 = smov 24  }
  0x31   :  { %769 = vmatpush.bf16.msra.mxu3 %v1205_v39  ;;  %v64_v13 = vld [vmem:[#allocation2 + $0x20] sm:$0xff]  ;;  %v65_v19 = vld [vmem:[#allocation2 + $0x28] sm:$0xff]  ;;  %v954_v28 = vld [vmem:[#allocation5 + $0x54] sm:$0xf0] }
  0x32   :  { %776 = vmatpush.bf16.msrb.mxu0 %v1005_v40  ;;  %v1548_v16 = vpack.c.bf16 %v64_v13, %v60_v12  ;;  %v1382_v20 = vld [vmem:[#allocation5 + $0x2a4] sm:$0xf]  ;;  %v1552_v23 = vpack.c.bf16 %v65_v19, %v61_v18  ;;  %v1307_v27 = vld [vmem:[#allocation5 + $0x4c] sm:$0xf]  ;;  %v1050_v31 = vld [vmem:[#allocation5 + $0x114] sm:$0xf0] }
  0x33   :  { %790 = vmatpush.bf16.msrb.mxu1 %v1101_v41  ;;  %756 = vmatmul.bf16.vlgmr.msra.gmra.mxu2 %v1545_v4  ;;  %v1331_v29 = vld [vmem:[#allocation5 + $0x10c] sm:$0xf]  ;;  %v1257_v30 = vor.u32 %v1382_v20, %v1254_v21  ;;  %v1146_v33 = vld [vmem:[#allocation5 + $0x1d4] sm:$0xf0]  ;;  %v957_v36 = vor.u32 %v1307_v27, %v954_v28  ;;  %v1304_v39 = vld [vmem:[#allocation5 + $0x34] sm:$0xf] }
  0x34   :  { %804 = vmatpush.bf16.msrb.mxu2 %v1197_v42  ;;  %v1355_v32 = vld [vmem:[#allocation5 + $0x1cc] sm:$0xf]  ;;  %728 = vmatmul.bf16.vlgmr.msra.gmra.mxu0 %v1548_v16  ;;  %v1242_v35 = vld [vmem:[#allocation5 + $0x294] sm:$0xf0]  ;;  %v1053_v37 = vor.u32 %v1331_v29, %v1050_v31  ;;  %v942_v40 = vld [vmem:[#allocation5 + $0x3c] sm:$0xf0] }
  0x35   :  { %818 = vmatpush.bf16.msrb.mxu3 %v1293_v46  ;;  %v1379_v34 = vld [vmem:[#allocation5 + $0x28c] sm:$0xf]  ;;  %742 = vmatmul.bf16.vlgmr.msra.gmra.mxu1 %v1552_v23  ;;  %v1149_v38 = vor.u32 %v1355_v32, %v1146_v33  ;;  %v1328_v41 = vld [vmem:[#allocation5 + $0xf4] sm:$0xf]  ;;  %v1038_v43 = vld [vmem:[#allocation5 + $0xfc] sm:$0xf0]  ;;  %v945_v48 = vor.u32 %v1304_v39, %v942_v40 }
  0x36   :  { %777 = vmatpush.bf16.msrb.mxu0 %v993_v52  ;;  %770 = vmatmul.bf16.vlgmr.msra.gmra.mxu3 %v1550_v22  ;;  %v1245_v42 = vor.u32 %v1379_v34, %v1242_v35  ;;  %v1352_v44 = vld [vmem:[#allocation5 + $0x1b4] sm:$0xf]  ;;  %v1134_v45 = vld [vmem:[#allocation5 + $0x1bc] sm:$0xf0]  ;;  %v1041_v49 = vor.u32 %v1328_v41, %v1038_v43  ;;  %v1301_v51 = vld [vmem:[#allocation5 + $0x1c] sm:$0xf] }
  0x37   :  { %791 = vmatpush.bf16.msrb.mxu1 %v1089_v56  ;;  %v1376_v46 = vld [vmem:[#allocation5 + $0x274] sm:$0xf]  ;;  %v1230_v47 = vld [vmem:[#allocation5 + $0x27c] sm:$0xf0]  ;;  %v1137_v50 = vor.u32 %v1352_v44, %v1134_v45  ;;  %v930_v52 = vld [vmem:[#allocation5 + $0x24] sm:$0xf0] }
  0x38   :  { %805 = vmatpush.bf16.msrb.mxu2 %v1185_v57  ;;  %v1325_v53 = vld [vmem:[#allocation5 + $0xdc] sm:$0xf]  ;;  %v1233_v54 = vor.u32 %v1376_v46, %v1230_v47  ;;  %v1026_v55 = vld [vmem:[#allocation5 + $0xe4] sm:$0xf0]  ;;  %v933_v60 = vor.u32 %v1301_v51, %v930_v52  ;;  %v918_v62 = vld [vmem:[#allocation5 + $0xc] sm:$0xf0] }
  0x39   :  { %819 = vmatpush.bf16.msrb.mxu3 %v1281_v61  ;;  %v1349_v56 = vld [vmem:[#allocation5 + $0x19c] sm:$0xf]  ;;  %v1122_v57 = vld [vmem:[#allocation5 + $0x1a4] sm:$0xf0]  ;;  %v1298_v61 = vld [vmem:[#allocation5 + $0x4] sm:$0xf]  ;;  %v1029_v63 = vor.u32 %v1325_v53, %v1026_v55 }
  0x3a   :  { %778 = vmatpush.bf16.msrb.mxu0 %v981_v5  ;;  %v1373_v58 = vld [vmem:[#allocation5 + $0x25c] sm:$0xf]  ;;  %v1218_v59 = vld [vmem:[#allocation5 + $0x264] sm:$0xf0]  ;;  %v1125_v0 = vor.u32 %v1349_v56, %v1122_v57  ;;  %v1322_v1 = vld [vmem:[#allocation5 + $0xc4] sm:$0xf]  ;;  %v921_v12 = vor.u32 %v1298_v61, %v918_v62 }
  0x3b   :  { %792 = vmatpush.bf16.msrb.mxu1 %v1077_v10  ;;  %v1014_v2 = vld [vmem:[#allocation5 + $0xcc] sm:$0xf0]  ;;  %v1346_v3 = vld [vmem:[#allocation5 + $0x184] sm:$0xf]  ;;  %v1221_v5 = vor.u32 %v1373_v58, %v1218_v59  ;;  %v1321_v10 = vld [vmem:[#allocation5 + $0xb8] sm:$0xf0] }
  0x3c   :  { %806 = vmatpush.bf16.msrb.mxu2 %v1173_v11  ;;  %v1110_v6 = vld [vmem:[#allocation5 + $0x18c] sm:$0xf0]  ;;  %v1370_v7 = vld [vmem:[#allocation5 + $0x244] sm:$0xf]  ;;  %v1345_v13 = vld [vmem:[#allocation5 + $0x178] sm:$0xf0]  ;;  %v1017_v17 = vor.u32 %v1322_v1, %v1014_v2 }
  0x3d   :  { %820 = vmatpush.bf16.msrb.mxu3 %v1269_v15  ;;  %v1206_v8 = vld [vmem:[#allocation5 + $0x24c] sm:$0xf0]  ;;  %v1369_v15 = vld [vmem:[#allocation5 + $0x238] sm:$0xf0]  ;;  %v1113_v18 = vor.u32 %v1346_v3, %v1110_v6  ;;  %v996_v27 = vld [vmem:[#allocation5 + $0x98] sm:$0xf] }
  0x3e   :  { %779 = vmatpush.bf16.msrb.mxu0 %v969_v24  ;;  %v1008_v9 = vld [vmem:[#allocation5 + $0xb0] sm:$0xf]  ;;  %v1393_v20 = vld [vmem:[#allocation5 + $0x2f8] sm:$0xf0]  ;;  %v1209_v21 = vor.u32 %v1370_v7, %v1206_v8  ;;  %v1318_v28 = vld [vmem:[#allocation5 + $0xa0] sm:$0xf0] }
  0x3f   :  { %793 = vmatpush.bf16.msrb.mxu1 %v1065_v25  ;;  %v1104_v11 = vld [vmem:[#allocation5 + $0x170] sm:$0xf]  ;;  %v1009_v24 = vor.u32 %v1321_v10, %v1008_v9  ;;  %v1092_v29 = vld [vmem:[#allocation5 + $0x158] sm:$0xf]  ;;  %v1342_v31 = vld [vmem:[#allocation5 + $0x160] sm:$0xf0] }
  0x40   :  { %807 = vmatpush.bf16.msrb.mxu2 %v1161_v26  ;;  %v1200_v14 = vld [vmem:[#allocation5 + $0x230] sm:$0xf]  ;;  %v1105_v25 = vor.u32 %v1345_v13, %v1104_v11  ;;  %v1188_v32 = vld [vmem:[#allocation5 + $0x218] sm:$0xf]  ;;  %v1366_v33 = vld [vmem:[#allocation5 + $0x220] sm:$0xf0] }
  0x41   :  { %821 = vmatpush.bf16.msrb.mxu3 %v1257_v30  ;;  %v1296_v19 = vld [vmem:[#allocation5 + $0x2f0] sm:$0xf]  ;;  %v1201_v26 = vor.u32 %v1369_v15, %v1200_v14  ;;  %v1284_v34 = vld [vmem:[#allocation5 + $0x2d8] sm:$0xf]  ;;  %v1390_v35 = vld [vmem:[#allocation5 + $0x2e0] sm:$0xf0] }
  0x42   :  { %780 = vmatpush.bf16.msrb.mxu0 %v957_v36  ;;  %v1297_v30 = vor.u32 %v1393_v20, %v1296_v19  ;;  %v997_v36 = vor.u32 %v1318_v28, %v996_v27  ;;  %v984_v39 = vld [vmem:[#allocation5 + $0x80] sm:$0xf]  ;;  %v1315_v40 = vld [vmem:[#allocation5 + $0x88] sm:$0xf0]  ;;  %v972_v51 = vld [vmem:[#allocation5 + $0x68] sm:$0xf] }
  0x43   :  { %794 = vmatpush.bf16.msrb.mxu1 %v1053_v37  ;;  %v1093_v37 = vor.u32 %v1342_v31, %v1092_v29  ;;  %v1080_v41 = vld [vmem:[#allocation5 + $0x140] sm:$0xf]  ;;  %v1339_v43 = vld [vmem:[#allocation5 + $0x148] sm:$0xf0]  ;;  %v1312_v52 = vld [vmem:[#allocation5 + $0x70] sm:$0xf0] }
  0x44   :  { %808 = vmatpush.bf16.msrb.mxu2 %v1149_v38  ;;  %v1189_v38 = vor.u32 %v1366_v33, %v1188_v32  ;;  %v1176_v44 = vld [vmem:[#allocation5 + $0x200] sm:$0xf]  ;;  %v1363_v45 = vld [vmem:[#allocation5 + $0x208] sm:$0xf0]  ;;  %v1068_v53 = vld [vmem:[#allocation5 + $0x128] sm:$0xf] }
  0x45   :  { %822 = vmatpush.bf16.msrb.mxu3 %v1245_v42  ;;  %v1285_v42 = vor.u32 %v1390_v35, %v1284_v34  ;;  %v1272_v46 = vld [vmem:[#allocation5 + $0x2c0] sm:$0xf]  ;;  %v1387_v47 = vld [vmem:[#allocation5 + $0x2c8] sm:$0xf0]  ;;  %v1336_v55 = vld [vmem:[#allocation5 + $0x130] sm:$0xf0] }
  0x46   :  { %781 = vmatpush.bf16.msrb.mxu0 %v945_v48  ;;  %v985_v48 = vor.u32 %v1315_v40, %v984_v39  ;;  %v1164_v56 = vld [vmem:[#allocation5 + $0x1e8] sm:$0xf]  ;;  %v1360_v57 = vld [vmem:[#allocation5 + $0x1f0] sm:$0xf0]  ;;  %v1069_v61 = vor.u32 %v1336_v55, %v1068_v53  ;;  %v1056_v1 = vld [vmem:[#allocation5 + $0x110] sm:$0xf] }
  0x47   :  { %795 = vmatpush.bf16.msrb.mxu1 %v1041_v49  ;;  %v1081_v49 = vor.u32 %v1339_v43, %v1080_v41  ;;  %v1260_v58 = vld [vmem:[#allocation5 + $0x2a8] sm:$0xf]  ;;  %v1384_v59 = vld [vmem:[#allocation5 + $0x2b0] sm:$0xf0]  ;;  %v1165_v62 = vor.u32 %v1360_v57, %v1164_v56  ;;  %v1333_v3 = vld [vmem:[#allocation5 + $0x118] sm:$0xf0] }
  0x48   :  { %809 = vmatpush.bf16.msrb.mxu2 %v1137_v50  ;;  %v1177_v50 = vor.u32 %v1363_v45, %v1176_v44  ;;  %v1261_v2 = vor.u32 %v1384_v59, %v1260_v58  ;;  %v1357_v6 = vld [vmem:[#allocation5 + $0x1d8] sm:$0xf0]  ;;  %v1248_v7 = vld [vmem:[#allocation5 + $0x290] sm:$0xf]  ;;  %v1057_v10 = vor.u32 %v1333_v3, %v1056_v1  ;;  %v1306_v13 = vld [vmem:[#allocation5 + $0x40] sm:$0xf0] }
  0x49   :  { %823 = vmatpush.bf16.msrb.mxu3 %v1233_v54  ;;  %v1273_v54 = vor.u32 %v1387_v47, %v1272_v46  ;;  %v1381_v8 = vld [vmem:[#allocation5 + $0x298] sm:$0xf0]  ;;  %v1044_v14 = vld [vmem:[#allocation5 + $0xf8] sm:$0xf]  ;;  %v1354_v19 = vld [vmem:[#allocation5 + $0x1c0] sm:$0xf0] }
  0x4a   :  { %782 = vmatpush.bf16.msrb.mxu0 %v933_v60  ;;  %v973_v60 = vor.u32 %v1312_v52, %v972_v51  ;;  %v1249_v15 = vor.u32 %v1381_v8, %v1248_v7  ;;  %v1236_v20 = vld [vmem:[#allocation5 + $0x278] sm:$0xf]  ;;  %v936_v27 = vld [vmem:[#allocation5 + $0x20] sm:$0xf]  ;;  %v1303_v28 = vld [vmem:[#allocation5 + $0x28] sm:$0xf0] }
  0x4b   :  { %796 = vmatpush.bf16.msrb.mxu1 %v1029_v63  ;;  %v960_v63 = vld [vmem:[#allocation5 + $0x50] sm:$0xf]  ;;  %v1032_v29 = vld [vmem:[#allocation5 + $0xe0] sm:$0xf]  ;;  %v1327_v31 = vld [vmem:[#allocation5 + $0xe8] sm:$0xf0] }
  0x4c   :  { %810 = vmatpush.bf16.msrb.mxu2 %v1125_v0  ;;  %v1309_v0 = vld [vmem:[#allocation5 + $0x58] sm:$0xf0]  ;;  %v1128_v32 = vld [vmem:[#allocation5 + $0x1a0] sm:$0xf]  ;;  %v1351_v33 = vld [vmem:[#allocation5 + $0x1a8] sm:$0xf0] }
  0x4d   :  { %824 = vmatpush.bf16.msrb.mxu3 %v1221_v5  ;;  %v1152_v5 = vld [vmem:[#allocation5 + $0x1d0] sm:$0xf]  ;;  %v961_v9 = vor.u32 %v1309_v0, %v960_v63  ;;  %v1224_v34 = vld [vmem:[#allocation5 + $0x260] sm:$0xf]  ;;  %v1375_v35 = vld [vmem:[#allocation5 + $0x268] sm:$0xf0] }
  0x4e   :  { %783 = vmatpush.bf16.msrb.mxu0 %v921_v12  ;;  %v1153_v11 = vor.u32 %v1357_v6, %v1152_v5  ;;  %v948_v12 = vld [vmem:[#allocation5 + $0x38] sm:$0xf]  ;;  %v924_v39 = vld [vmem:[#allocation5 + $0x8] sm:$0xf]  ;;  %v1300_v40 = vld [vmem:[#allocation5 + $0x10] sm:$0xf0] }
  0x4f   :  { %797 = vmatpush.bf16.msrb.mxu1 %v1017_v17  ;;  %v1330_v17 = vld [vmem:[#allocation5 + $0x100] sm:$0xf0]  ;;  %v1020_v41 = vld [vmem:[#allocation5 + $0xc8] sm:$0xf]  ;;  %v1324_v43 = vld [vmem:[#allocation5 + $0xd0] sm:$0xf0] }
  0x50   :  { %811 = vmatpush.bf16.msrb.mxu2 %v1113_v18  ;;  %v1140_v18 = vld [vmem:[#allocation5 + $0x1b8] sm:$0xf]  ;;  %v1116_v44 = vld [vmem:[#allocation5 + $0x188] sm:$0xf]  ;;  %v1348_v45 = vld [vmem:[#allocation5 + $0x190] sm:$0xf0] }
  0x51   :  { %825 = vmatpush.bf16.msrb.mxu3 %v1209_v21  ;;  %784 = vmatmul.bf16.vlgmr.msrb.gmra.mxu0 %v1548_v16  ;;  %v1378_v21 = vld [vmem:[#allocation5 + $0x280] sm:$0xf0]  ;;  %v1212_v46 = vld [vmem:[#allocation5 + $0x248] sm:$0xf]  ;;  %v1372_v47 = vld [vmem:[#allocation5 + $0x250] sm:$0xf0] }
  0x52   :  { %832 = vmatpush.bf16.msra.mxu0 %v1009_v24  ;;  %798 = vmatmul.bf16.vlgmr.msrb.gmra.mxu1 %v1552_v23  ;;  %v949_v24 = vor.u32 %v1306_v13, %v948_v12  ;;  %v1213_v51 = vor.u32 %v1372_v47, %v1212_v46  ;;  %v200_v52 = vld [vmem:[#allocation7] sm:$0x7] }
  0x53   :  { %846 = vmatpush.bf16.msra.mxu1 %v1105_v25  ;;  %812 = vmatmul.bf16.vlgmr.msrb.gmra.mxu2 %v1545_v4  ;;  %v1045_v25 = vor.u32 %v1330_v17, %v1044_v14  ;;  %v202_v53 = vperm.slane %v200_v52, 0 }
  0x54   :  { %860 = vmatpush.bf16.msra.mxu2 %v1201_v26  ;;  %826 = vmatmul.bf16.vlgmr.msrb.gmra.mxu3 %v1550_v22  ;;  %v1141_v26 = vor.u32 %v1354_v19, %v1140_v18 }
  0x55   :  { %874 = vmatpush.bf16.msra.mxu3 %v1297_v30  ;;  %v1237_v30 = vor.u32 %v1378_v21, %v1236_v20  ;;  %v204_v21 = vperm.slane %v200_v52, 2 }
  0x56   :  { %833 = vmatpush.bf16.msra.mxu0 %v997_v36  ;;  %v937_v36 = vor.u32 %v1303_v28, %v936_v27 }
  0x57   :  { %847 = vmatpush.bf16.msra.mxu1 %v1093_v37  ;;  %v1033_v37 = vor.u32 %v1327_v31, %v1032_v29 }
  0x58   :  { %861 = vmatpush.bf16.msra.mxu2 %v1189_v38  ;;  %v1129_v38 = vor.u32 %v1351_v33, %v1128_v32 }
  0x59   :  { %875 = vmatpush.bf16.msra.mxu3 %v1285_v42  ;;  %v1225_v42 = vor.u32 %v1375_v35, %v1224_v34 }
  0x5a   :  { %834 = vmatpush.bf16.msra.mxu0 %v985_v48  ;;  %v925_v48 = vor.u32 %v1300_v40, %v924_v39 }
  0x5b   :  { %848 = vmatpush.bf16.msra.mxu1 %v1081_v49  ;;  %v1021_v49 = vor.u32 %v1324_v43, %v1020_v41 }
  0x5c   :  { %862 = vmatpush.bf16.msra.mxu2 %v1177_v50  ;;  %v1117_v50 = vor.u32 %v1348_v45, %v1116_v44 }
  0x5d   :  { %876 = vmatpush.bf16.msra.mxu3 %v1273_v54 }
  0x5e   :  { %835 = vmatpush.bf16.msra.mxu0 %v973_v60 }
  0x5f   :  { %849 = vmatpush.bf16.msra.mxu1 %v1069_v61 }
  0x60   :  { %863 = vmatpush.bf16.msra.mxu2 %v1165_v62 }
  0x61   :  { %877 = vmatpush.bf16.msra.mxu3 %v1261_v2 }
  0x62   :  { %836 = vmatpush.bf16.msra.mxu0 %v961_v9 }
  0x63   :  { %850 = vmatpush.bf16.msra.mxu1 %v1057_v10 }
  0x64   :  { %864 = vmatpush.bf16.msra.mxu2 %v1153_v11 }
  0x65   :  { %878 = vmatpush.bf16.msra.mxu3 %v1249_v15 }
  0x66   :  { %837 = vmatpush.bf16.msra.mxu0 %v949_v24 }
  0x67   :  { %851 = vmatpush.bf16.msra.mxu1 %v1045_v25 }
  0x68   :  { %865 = vmatpush.bf16.msra.mxu2 %v1141_v26 }
  0x69   :  { %879 = vmatpush.bf16.msra.mxu3 %v1237_v30 }
  0x6a   :  { %838 = vmatpush.bf16.msra.mxu0 %v937_v36 }
  0x6b   :  { %852 = vmatpush.bf16.msra.mxu1 %v1033_v37 }
  0x6c   :  { %866 = vmatpush.bf16.msra.mxu2 %v1129_v38 }
  0x6d   :  { %880 = vmatpush.bf16.msra.mxu3 %v1225_v42 }
  0x6e   :  { %839 = vmatpush.bf16.msra.mxu0 %v925_v48 }
  0x6f   :  { %853 = vmatpush.bf16.msra.mxu1 %v1021_v49 }
  0x70   :  { %867 = vmatpush.bf16.msra.mxu2 %v1117_v50 }
  0x71   :  { %881 = vmatpush.bf16.msra.mxu3 %v1213_v51  ;;  %840 = vmatmul.bf16.vlgmr.msra.gmra.mxu0 %v1548_v16 }
  0x72   :  { %854 = vmatmul.bf16.vlgmr.msra.gmra.mxu1 %v1552_v23 }
  0x73   :  { %868 = vmatmul.bf16.vlgmr.msra.gmra.mxu2 %v1545_v4 }
  0x74   :  { %882 = vmatmul.bf16.vlgmr.msra.gmra.mxu3 %v1550_v22  ;;  %v203_v22 = vperm.slane %v200_v52, 1 }
  0xb1   :  { %v729_v54 = vpop.f32.mrf.mxu0 }
  0xb2   :  { %v730_v55 = vadd.f32 %v729_v54, %v202_v53  ;;  %v743_v56 = vpop.f32.mrf.mxu1 }
  0xb4   :  { %v744_v58 = vadd.f32 %v743_v56, %v730_v55 }
  0xb6   :  { %v757_v57 = vpop.f32.mrf.mxu2 }
  0xb7   :  { %v758_v59 = vadd.f32 %v757_v57, %v744_v58 }
  0xb9   :  { %v771_v60 = vpop.f32.mrf.mxu3  ;;  %v731_v62 = vpop.f32.mrf.mxu0 }
  0xba   :  { %v772_v61 = vadd.f32 %v771_v60, %v758_v59  ;;  %v732_v63 = vadd.f32 %v731_v62, %v202_v53  ;;  %v745_v0 = vpop.f32.mrf.mxu1 }
  0xbc   :  { %888 = vst [vmem:[#allocation8] sm:$0xff] %v772_v61  ;;  %v746_v23 = vadd.f32 %v745_v0, %v732_v63 }
  0xbe   :  { %v759_v16 = vpop.f32.mrf.mxu2 }
  0xbf   :  { %v760_v1 = vadd.f32 %v759_v16, %v746_v23 }
  0xc1   :  { %v773_v4 = vpop.f32.mrf.mxu3 }
  0xc2   :  { %v774_v2 = vadd.f32 %v773_v4, %v760_v1 }
  0xc4   :  { %891 = vst [vmem:[#allocation8 + $0x18] sm:$0xff] %v774_v2 }
  0xce   :  { %v785_v3 = vpop.f32.mrf.mxu0 }
  0xcf   :  { %v786_v5 = vadd.f32 %v785_v3, %v203_v22  ;;  %v799_v6 = vpop.f32.mrf.mxu1 }
  0xd1   :  { %v800_v7 = vadd.f32 %v799_v6, %v786_v5 }
  0xd6   :  { %v813_v8 = vpop.f32.mrf.mxu2  ;;  %v787_v12 = vpop.f32.mrf.mxu0 }
  0xd7   :  { %v814_v9 = vadd.f32 %v813_v8, %v800_v7  ;;  %v827_v10 = vpop.f32.mrf.mxu3  ;;  %v788_v13 = vadd.f32 %v787_v12, %v203_v22  ;;  %v801_v14 = vpop.f32.mrf.mxu1 }
  0xd9   :  { %v828_v11 = vadd.f32 %v827_v10, %v814_v9  ;;  %v802_v15 = vadd.f32 %v801_v14, %v788_v13 }
  0xdb   :  { %889 = vst [vmem:[#allocation8 + $0x8] sm:$0xff] %v828_v11 }
  0xde   :  { %v815_v17 = vpop.f32.mrf.mxu2 }
  0xdf   :  { %v816_v18 = vadd.f32 %v815_v17, %v802_v15  ;;  %v829_v19 = vpop.f32.mrf.mxu3 }
  0xe1   :  { %v830_v20 = vadd.f32 %v829_v19, %v816_v18 }
  0xe3   :  { %892 = vst [vmem:[#allocation8 + $0x20] sm:$0xff] %v830_v20 }
  0xee   :  { %v841_v24 = vpop.f32.mrf.mxu0 }
  0xef   :  { %v842_v25 = vadd.f32 %v841_v24, %v204_v21  ;;  %v855_v26 = vpop.f32.mrf.mxu1 }
  0xf1   :  { %v856_v27 = vadd.f32 %v855_v26, %v842_v25 }
  0xf6   :  { %v869_v28 = vpop.f32.mrf.mxu2  ;;  %v843_v31 = vpop.f32.mrf.mxu0 }
  0xf7   :  { %v870_v29 = vadd.f32 %v869_v28, %v856_v27  ;;  %v883_v30 = vpop.f32.mrf.mxu3  ;;  %v844_v33 = vadd.f32 %v843_v31, %v204_v21  ;;  %v857_v34 = vpop.f32.mrf.mxu1 }
  0xf9   :  { %v884_v32 = vadd.f32 %v883_v30, %v870_v29  ;;  %v858_v35 = vadd.f32 %v857_v34, %v844_v33 }
  0xfb   :  { %890 = vst [vmem:[#allocation8 + $0x10] sm:$0xff] %v884_v32 }
  0xfe   :  { %v871_v36 = vpop.f32.mrf.mxu2 }
  0xff   :  { %v872_v37 = vadd.f32 %v871_v36, %v858_v35  ;;  %v885_v38 = vpop.f32.mrf.mxu3 }
 0x101   :  { %v886_v39 = vadd.f32 %v885_v38, %v872_v37 }
 0x103   :  { %893 = vst [vmem:[#allocation8 + $0x28] sm:$0xff] %v886_v39 }
 0x104   :  { %906 = dma.vmem_to_hbm [thread:$0]  %s899_s2, 768, %s901_s5, [#allocation4], %s1514_s6, %s1514_s6, %s1515_s7  }
 0x105   :  { %1504 = dma.done.wait [#allocation4], 768  }
 0x106   :  { %1505 = vsyncadd [#allocation4], 4294966528 }
 0x107   :  { %911 = vsyncpa [#allocation3], 1 }
 0x108   :  { %912 = vsyncpa [#allocation6], 1 }
 0x109   :  { %913 = vsyncpa [#allocation4], 1 }

</bundles_post_ra>
